<compile_context>
chip_gen: v6e
topology: v6e:2x2x1
jax: 0.10.0
libtpu: 0.0.40
codegen_flags: <defaults>
</compile_context>

<pallas_src>
import functools
import math

import jax
import jax.numpy as jnp
from jax.experimental import pallas as pl
from jax.experimental.pallas import tpu as pltpu


# ---------------------------------------------------------------------------
# Hardware-aware budgets
# ---------------------------------------------------------------------------

def _tpu_vmem_bytes():
    try:
        info = pltpu.get_tpu_info()
        for attr in ("vmem_capacity_bytes", "vmem_size_bytes", "vmem_bytes"):
            v = getattr(info, attr, None)
            if isinstance(v, int) and v > 0:
                return v
    except Exception:
        pass
    return 64 << 20          # conservative default: v7x per-core VMEM


_VMEM_BYTES = _tpu_vmem_bytes()
# Scoped-VMEM limit we request from Mosaic; leave headroom below physical.
_VMEM_LIMIT = int(max(32 << 20, min(_VMEM_BYTES * 3 // 4, 100 << 20)))
_BIG_VMEM = _VMEM_BYTES >= (96 << 20)       # v5e / v6e (128 MiB) vs v7x (64 MiB)

_LIN_TM_CAP = 512
_LIN_TN_CAP = 512
_LIN_TK_CAP = 1024 if _BIG_VMEM else 512


def _pick_tile(dim, cap, aligns=(256, 128, 8)):
    """Largest divisor of `dim` <= cap, preferring MXU/sublane-aligned sizes.

    Never exceeds `cap` when dim > cap, so one tile can never blow the scoped
    VMEM limit (previous version silently fell back to the full dimension)."""
    if dim <= cap:
        return dim
    for a in aligns:
        t = (cap // a) * a
        while t >= a:
            if dim % t == 0:
                return t
            t -= a
    for t in range(min(cap, dim), 0, -1):
        if dim % t == 0:
            return t
    return 1


def _fused_ln_tm_cap(D, tk, out_bytes=4):
    """Row-tile cap for the fused matmul+LN kernel, sized so the (tm, D) f32
    accumulator + double-buffered resid/out/x/w blocks fit the VMEM budget."""
    per_row = D * (4 + 8 + 2 * out_bytes) + 8 * tk   # acc + resid(x2) + out(x2) + x(x2)
    fixed = 4 * tk * D + 24 * D + (1 << 20)          # w(x2, bf16) + bias/gamma/beta + slack
    avail = _VMEM_LIMIT - fixed
    if avail <= per_row * 8:
        return 8
    return int(min(512, avail // per_row))


# ---------------------------------------------------------------------------
# Tiled linear (+ bias, optional ReLU)
# ---------------------------------------------------------------------------

def _linear_kernel(x_ref, w_ref, b_ref, o_ref, acc_ref, *, activation):
    @pl.when(pl.program_id(2) == 0)
    def _():
        acc_ref[...] = jnp.zeros_like(acc_ref)

    # Cast the activation to bf16 in vregs (free under the MXU); weights are
    # already bf16 in HBM.  f32 accumulation in VMEM scratch.
    acc_ref[...] += jnp.dot(x_ref[...].astype(jnp.bfloat16), w_ref[...],
                            preferred_element_type=jnp.float32)

    @pl.when(pl.program_id(2) == pl.num_programs(2) - 1)
    def _():
        out = acc_ref[...] + b_ref[...]
        if activation == "relu":
            out = jnp.maximum(out, 0.0)
        o_ref[...] = out.astype(o_ref.dtype)


def linear(x, w, b, *, activation=None, out_dtype=jnp.float32):
    """x: [M, K] (any float dtype), w: [K, N] bf16, b: [N] f32 -> [M, N]."""
    M, K = x.shape
    N = w.shape[1]
    tm = _pick_tile(M, _LIN_TM_CAP)
    tn = _pick_tile(N, _LIN_TN_CAP, aligns=(128, 8))
    tk = _pick_tile(K, _LIN_TK_CAP, aligns=(128, 8))
    kernel = functools.partial(_linear_kernel, activation=activation)
    return pl.pallas_call(
        kernel,
        out_shape=jax.ShapeDtypeStruct((M, N), out_dtype),
        grid=(M // tm, N // tn, K // tk),
        in_specs=[pl.BlockSpec((tm, tk), lambda i, j, k: (i, k)),
                  pl.BlockSpec((tk, tn), lambda i, j, k: (k, j)),
                  pl.BlockSpec((1, tn), lambda i, j, k: (0, j))],
        out_specs=pl.BlockSpec((tm, tn), lambda i, j, k: (i, j)),
        scratch_shapes=[pltpu.VMEM((tm, tn), jnp.float32)],
        compiler_params=pltpu.CompilerParams(
            dimension_semantics=("parallel", "parallel", "arbitrary"),
            vmem_limit_bytes=_VMEM_LIMIT),
    )(x, w, b.reshape(1, N).astype(jnp.float32))


# ---------------------------------------------------------------------------
# Fused: matmul + bias + residual + LayerNorm (full-width N so LN sees the row)
# ---------------------------------------------------------------------------

def _linear_res_ln_kernel(x_ref, w_ref, b_ref, r_ref, g_ref, bt_ref, o_ref,
                          acc_ref, *, eps):
    @pl.when(pl.program_id(1) == 0)
    def _():
        acc_ref[...] = jnp.zeros_like(acc_ref)

    acc_ref[...] += jnp.dot(x_ref[...].astype(jnp.bfloat16), w_ref[...],
                            preferred_element_type=jnp.float32)

    @pl.when(pl.program_id(1) == pl.num_programs(1) - 1)
    def _():
        y = acc_ref[...] + b_ref[...] + r_ref[...]          # dropout = identity
        mean = jnp.mean(y, axis=-1, keepdims=True)
        var = jnp.mean(jnp.square(y - mean), axis=-1, keepdims=True)
        yn = (y - mean) * jax.lax.rsqrt(var + eps)
        o_ref[...] = (yn * g_ref[...] + bt_ref[...]).astype(o_ref.dtype)


def linear_residual_layernorm(x, w, b, resid, gamma, beta, *, eps=1e-12):
    """LayerNorm((x @ w + b) + resid) over the last axis. x:[M,K] -> [M,D] f32."""
    M, K = x.shape
    D = w.shape[1]
    tk = _pick_tile(K, _LIN_TK_CAP, aligns=(128, 8))
    tm = _pick_tile(M, max(8, _fused_ln_tm_cap(D, tk)))
    kernel = functools.partial(_linear_res_ln_kernel, eps=eps)
    return pl.pallas_call(
        kernel,
        out_shape=jax.ShapeDtypeStruct((M, D), jnp.float32),
        grid=(M // tm, K // tk),
        in_specs=[pl.BlockSpec((tm, tk), lambda i, k: (i, k)),
                  pl.BlockSpec((tk, D), lambda i, k: (k, 0)),
                  pl.BlockSpec((1, D), lambda i, k: (0, 0)),
                  pl.BlockSpec((tm, D), lambda i, k: (i, 0)),
                  pl.BlockSpec((1, D), lambda i, k: (0, 0)),
                  pl.BlockSpec((1, D), lambda i, k: (0, 0))],
        out_specs=pl.BlockSpec((tm, D), lambda i, k: (i, 0)),
        scratch_shapes=[pltpu.VMEM((tm, D), jnp.float32)],
        compiler_params=pltpu.CompilerParams(
            dimension_semantics=("parallel", "arbitrary"),
            vmem_limit_bytes=_VMEM_LIMIT),
    )(x, w, b.reshape(1, D), resid, gamma.reshape(1, D), beta.reshape(1, D))


# ---------------------------------------------------------------------------
# Multi-head attention core.
#   Input: one fused [B, S, 3, D] qkv slab (columns [q|k|v], D = H*hd), so the
#   head/qkv split is done in-kernel with static lane slices (no HBM slices).
#   Heads are processed one at a time so the live score tensor is (S, S), not
#   (H, S, S); the loop is a static Python unroll over the (small, static) H.
# ---------------------------------------------------------------------------

def _attention_kernel(qkv_ref, m_ref, o_ref, *, scale, num_heads, head_dim):
    mask = m_ref[0]                        # (S, S) bf16, 1 = keep, 0 = masked
    masked = mask == 0
    neg = jnp.float32(-10000.0)

    # TODO(synk): flash-style KV tiling (online softmax) + (B, q_block) grid for
    # long sequences / v7x megacore; per-head (S, S) scores are fine for demo S.
    for h in range(num_heads):             # static unroll; per-head 2-D MXU dots
        lo, hi = h * head_dim, (h + 1) * head_dim
        q = qkv_ref[0, :, 0, lo:hi]        # (S, hd) bf16
        k = qkv_ref[0, :, 1, lo:hi]
        v = qkv_ref[0, :, 2, lo:hi]
        s = jax.lax.dot_general(q, k, (((1,), (1,)), ((), ())),
                                preferred_element_type=jnp.float32) * scale
        s = jnp.where(masked, neg, s)
        s = s - jnp.max(s, axis=-1, keepdims=True)
        p = jnp.exp(s)
        p = p * pl.reciprocal(jnp.sum(p, axis=-1, keepdims=True), approx=True)
        o = jnp.dot(p.astype(v.dtype), v, preferred_element_type=jnp.float32)
        o_ref[0, :, lo:hi] = o.astype(o_ref.dtype)


def attention(qkv, mask, num_heads):
    """qkv: [B, S, 3, D] bf16; mask: [B, S, S] bf16 -> [B, S, D] bf16."""
    B, S, _, D = qkv.shape
    hd = D // num_heads
    scale = 1.0 / math.sqrt(hd)
    kernel = functools.partial(_attention_kernel, scale=scale,
                               num_heads=num_heads, head_dim=hd)
    return pl.pallas_call(
        kernel,
        out_shape=jax.ShapeDtypeStruct((B, S, D), jnp.bfloat16),
        grid=(B,),
        in_specs=[pl.BlockSpec((1, S, 3, D), lambda b: (b, 0, 0, 0)),
                  pl.BlockSpec((1, S, S), lambda b: (b, 0, 0))],
        out_specs=pl.BlockSpec((1, S, D), lambda b: (b, 0, 0)),
        compiler_params=pltpu.CompilerParams(
            dimension_semantics=("parallel",),
            vmem_limit_bytes=_VMEM_LIMIT),
    )(qkv, mask)


# ---------------------------------------------------------------------------
# Model glue (parameter init, embedding lookup, block / encoder wrappers)
# ---------------------------------------------------------------------------

def sinusoidal_pos_encoding(max_len, d_model):
    pos = jnp.arange(max_len, dtype=jnp.float32)[:, None]
    i2 = jnp.arange(0, d_model, 2, dtype=jnp.float32)[None, :]
    angle = pos / jnp.power(10000.0, i2 / d_model)
    pe = jnp.zeros((max_len, d_model), jnp.float32)
    pe = pe.at[:, 0::2].set(jnp.sin(angle))
    pe = pe.at[:, 1::2].set(jnp.cos(angle))
    return pe


def _init_linear(key, din, dout):
    kw, kb = jax.random.split(key)
    w = jax.random.normal(kw, (din, dout), jnp.float32) / math.sqrt(din)
    b = jax.random.normal(kb, (dout,), jnp.float32) * 0.01
    return w.astype(jnp.bfloat16), b     # bf16 weights (MXU-native), f32 bias


def init_params(key, *, num_layers, vocab_size, d_model, hidden):
    keys = jax.random.split(key, 1 + num_layers)
    emb = jax.random.normal(keys[0], (vocab_size, d_model), jnp.float32) * 0.02
    emb = emb.at[1].set(0.0)  # padding_idx=1 as in TokenEmbedding
    layers = []
    for i in range(num_layers):
        lk = jax.random.split(keys[1 + i], 6)
        wq, bq = _init_linear(lk[0], d_model, d_model)
        wk, bk = _init_linear(lk[1], d_model, d_model)
        wv, bv = _init_linear(lk[2], d_model, d_model)
        layers.append(dict(
            w_qkv=jnp.concatenate([wq, wk, wv], axis=1),   # [D, 3D] fused QKV
            b_qkv=jnp.concatenate([bq, bk, bv], axis=0),   # [3D]
            wo=_init_linear(lk[3], d_model, d_model),
            ffn1=_init_linear(lk[4], d_model, hidden),
            ffn2=_init_linear(lk[5], hidden, d_model),
            gamma=jnp.ones((d_model,), jnp.float32),   # single LayerNorm instance
            beta=jnp.zeros((d_model,), jnp.float32),   # reused for both norms
        ))
    return emb, layers


def encoder_block(x, mask, p, num_heads):
    B, S, D = x.shape
    xf = x.reshape(B * S, D)

    # --- fused QKV projection: one [D, 3D] matmul, bf16 output ---
    qkv = linear(xf, p["w_qkv"], p["b_qkv"], out_dtype=jnp.bfloat16)  # [M, 3D]
    qkv = qkv.reshape(B, S, 3, D)          # pure bitcast; columns are [q|k|v]

    # --- multi-head self-attention (head split done in-kernel) ---
    o = attention(qkv, mask, num_heads).reshape(B * S, D)

    # --- output proj + residual + LayerNorm 1 (fused; dropout = identity) ---
    x1 = linear_residual_layernorm(o, *p["wo"], xf, p["gamma"], p["beta"])

    # --- position-wise FFN; ffn2 fused with residual + LayerNorm 2 ---
    h = linear(x1, *p["ffn1"], activation="relu", out_dtype=jnp.bfloat16)
    x2 = linear_residual_layernorm(h, *p["ffn2"], x1, p["gamma"], p["beta"])
    return x2.reshape(B, S, D)


def encoder_forward(token_ids, mask, emb_table, pos_enc, layers, num_heads):
    B, S = token_ids.shape
    # TransformerEmbedding: token embedding + sinusoidal positional encoding
    # (gather kept as host-side XLA op; dropout = identity in eval)
    x = jnp.take(emb_table, token_ids, axis=0) + pos_enc[:S][None, :, :]
    # One-time mask shrink (0/1 in bf16) shared by every layer -> half the
    # per-layer [B,S,S] HBM traffic vs f32.
    mask_bf16 = (mask != 0).astype(jnp.bfloat16)
    for p in layers:
        x = encoder_block(x, mask_bf16, p, num_heads)
    return x


# ---------------------------------------------------------------------------
# Demo
# ---------------------------------------------------------------------------

if __name__ == "__main__":
    B, S = 2, 8
    vocab_size, max_len = 100, 16
    d_model, hidden, num_heads, num_layers = 32, 64, 4, 2

    key = jax.random.PRNGKey(0)
    k_tok, k_param = jax.random.split(key)

    token_ids = jax.random.randint(k_tok, (B, S), 0, vocab_size, dtype=jnp.int32)
    # mask: 1 = attend, 0 = masked (causal mask here), shape [B, S, S]
    mask = jnp.tile(jnp.tril(jnp.ones((S, S), jnp.float32))[None], (B, 1, 1))

    emb_table, layers = init_params(
        k_param, num_layers=num_layers, vocab_size=vocab_size,
        d_model=d_model, hidden=hidden)
    pos_enc = sinusoidal_pos_encoding(max_len, d_model)

    out = encoder_forward(token_ids, mask, emb_table, pos_enc, layers, num_heads)
    jax.block_until_ready(out)
    assert out.shape == (B, S, d_model) and out.dtype == jnp.float32
    print("KERNEL_OK")
</pallas_src>

<mosaic_0001>
module attributes {stable_mosaic.version = 11 : i64} {
  func.func @_linear_kernel(%arg0: i32, %arg1: i32, %arg2: i32, %arg3: memref<16x32xf32, #tpu.memory_space<vmem>>, %arg4: memref<32x96xbf16, #tpu.memory_space<vmem>>, %arg5: memref<1x96xf32, #tpu.memory_space<vmem>>, %arg6: memref<16x96xbf16, #tpu.memory_space<vmem>>, %arg7: memref<16x96xf32, #tpu.memory_space<vmem>>) attributes {dimension_semantics = [#tpu.dimension_semantics<parallel>, #tpu.dimension_semantics<parallel>, #tpu.dimension_semantics<arbitrary>], iteration_bounds = array<i64: 1, 1, 1>, scalar_prefetch = 0 : i64, scratch_operands = 1 : i64, tpu.core_type = #tpu.core_type<tc>, window_params = [{transform_indices = @transform_0, window_bounds = array<i64: 16, 32>}, {transform_indices = @transform_1, window_bounds = array<i64: 32, 96>}, {transform_indices = @transform_2, window_bounds = array<i64: 1, 96>}, {transform_indices = @transform_3, window_bounds = array<i64: 16, 96>}]} {
    %c0_i32 = arith.constant 0 : i32
    %0 = arith.cmpi eq, %arg2, %c0_i32 : i32
    %1 = arith.extui %0 : i1 to i32
    %c0_i32_0 = arith.constant 0 : i32
    %2 = arith.cmpi ne, %1, %c0_i32_0 : i32
    scf.if %2 {
      %cst_10 = arith.constant 0.000000e+00 : f32
      %13 = vector.broadcast %cst_10 : f32 to vector<16x96xf32>
      %c0_11 = arith.constant 0 : index
      %c0_12 = arith.constant 0 : index
      %14 = vector.load %arg7[%c0_11, %c0_12] : memref<16x96xf32, #tpu.memory_space<vmem>>, vector<16x96xf32>
      tpu.vector_store %arg7[%c0_11, %c0_12], %13 {strides = array<i32>} : memref<16x96xf32, #tpu.memory_space<vmem>>, vector<16x96xf32>,
    } else {
    }
    %c0 = arith.constant 0 : index
    %c0_1 = arith.constant 0 : index
    %3 = vector.load %arg7[%c0, %c0_1] : memref<16x96xf32, #tpu.memory_space<vmem>>, vector<16x96xf32>
    %c0_2 = arith.constant 0 : index
    %c0_3 = arith.constant 0 : index
    %4 = vector.load %arg3[%c0_2, %c0_3] : memref<16x32xf32, #tpu.memory_space<vmem>>, vector<16x32xf32>
    %5 = arith.truncf %4 : vector<16x32xf32> to vector<16x32xbf16>
    %c0_4 = arith.constant 0 : index
    %c0_5 = arith.constant 0 : index
    %6 = vector.load %arg4[%c0_4, %c0_5] : memref<32x96xbf16, #tpu.memory_space<vmem>>, vector<32x96xbf16>
    %cst = arith.constant dense<0.000000e+00> : vector<16x96xf32>
    %7 = tpu.matmul %5, %6, %cst {dimension_numbers = #tpu.dot_dimension_numbers<[1], [0], [0], [1], [0, 0, 1, 1], [], []>} : vector<16x32xbf16>, vector<32x96xbf16>, vector<16x96xf32> -> vector<16x96xf32>
    %8 = arith.addf %3, %7 : vector<16x96xf32>
    %c0_6 = arith.constant 0 : index
    %c0_7 = arith.constant 0 : index
    %9 = vector.load %arg7[%c0_6, %c0_7] : memref<16x96xf32, #tpu.memory_space<vmem>>, vector<16x96xf32>
    tpu.vector_store %arg7[%c0_6, %c0_7], %8 {strides = array<i32>} : memref<16x96xf32, #tpu.memory_space<vmem>>, vector<16x96xf32>,
    %c0_i32_8 = arith.constant 0 : i32
    %10 = arith.cmpi eq, %arg2, %c0_i32_8 : i32
    %11 = arith.extui %10 : i1 to i32
    %c0_i32_9 = arith.constant 0 : i32
    %12 = arith.cmpi ne, %11, %c0_i32_9 : i32
    scf.if %12 {
      %c0_10 = arith.constant 0 : index
      %c0_11 = arith.constant 0 : index
      %13 = vector.load %arg7[%c0_10, %c0_11] : memref<16x96xf32, #tpu.memory_space<vmem>>, vector<16x96xf32>
      %c0_12 = arith.constant 0 : index
      %c0_13 = arith.constant 0 : index
      %14 = vector.load %arg5[%c0_12, %c0_13] : memref<1x96xf32, #tpu.memory_space<vmem>>, vector<1x96xf32>
      %15 = vector.broadcast %14 : vector<1x96xf32> to vector<16x96xf32>
      %16 = arith.addf %13, %15 : vector<16x96xf32>
      %17 = arith.truncf %16 : vector<16x96xf32> to vector<16x96xbf16>
      %c0_14 = arith.constant 0 : index
      %c0_15 = arith.constant 0 : index
      %18 = vector.load %arg6[%c0_14, %c0_15] : memref<16x96xbf16, #tpu.memory_space<vmem>>, vector<16x96xbf16>
      tpu.vector_store %arg6[%c0_14, %c0_15], %17 {strides = array<i32>} : memref<16x96xbf16, #tpu.memory_space<vmem>>, vector<16x96xbf16>,
    } else {
    }
    return
  }
  func.func @transform_0(%arg0: i32, %arg1: i32, %arg2: i32) -> (i32, i32) {
    %c0_i32 = arith.constant 0 : i32
    return %arg0, %arg2 : i32, i32
  }
  func.func @transform_1(%arg0: i32, %arg1: i32, %arg2: i32) -> (i32, i32) {
    %c0_i32 = arith.constant 0 : i32
    return %arg2, %arg1 : i32, i32
  }
  func.func @transform_2(%arg0: i32, %arg1: i32, %arg2: i32) -> (i32, i32) {
    %c0_i32 = arith.constant 0 : i32
    %c0_i32_0 = arith.constant 0 : i32
    return %c0_i32, %arg1 : i32, i32
  }
  func.func @transform_3(%arg0: i32, %arg1: i32, %arg2: i32) -> (i32, i32) {
    %c0_i32 = arith.constant 0 : i32
    return %arg0, %arg1 : i32, i32
  }
}

</mosaic_0001>

<bundles_post_ra>
// kernel: tpu_custom_call.1
= control target key start
LH: loop header
LB: loop body
LE: loop exit
PB: predicated region body
PF: predicated region fallthrough
CT: control target
= control target key end

     0   :  { %8 = vsyncpa [#allocation4], 0  ;;  %s312_s0 = inlined_call_operand.hbm [shape: f32[16,32], index: 0, kind: input, shape index: {}]   ;;  %s313_s1 = inlined_call_operand.hbm [shape: bf16[32,96], index: 1, kind: input, shape index: {}]   ;;  %s314_s2 = inlined_call_operand.vmem [shape: f32[1,96], index: 2, kind: input, shape index: {}]   ;;  %s315_s3 = inlined_call_operand.hbm [shape: bf16[16,96], index: 3, kind: output, shape index: {}]  }
   0x1   :  { %9 = vsyncpa [#allocation7], 0 }
   0x2   :  { %10 = vsyncpa [#allocation5], 0  ;;  %s261_s12 = smov [#allocation3]  }
   0x3   :  { %s16_s13 = sshll.u32 %s261_s12, 4  ;;  %s17_s13 = int_to_ptr.vmem [resolvable:$true] %s16_s13 }
   0x4   :  { %s203_s14 = scalar_lea.vmem %s17_s13, 256  ;;  %p208_p1 = scmp.lt.s32.totalorder %s17_s13, %s17_s13 }
   0x5   :  { %p204_p0 = scmp.ne.s32.totalorder %s17_s13, %s203_s14  ;;  %p209_p2 = scmp.lt.s32.totalorder %s203_s14, %s203_s14 }
   0x7   :  { %p210_p3 = por %p209_p2, %p208_p1 }
   0x9   :  { %p211_p4 = pnand %p210_p3, %p204_p0 }
   0xb   :  { %214 = shalt.err (!%p211_p4)
}
   0xc   :  { %s262_s15 = smov 128   ;;  %s263_s16 = smov 8  }
   0xd   :  { %22 = dma.hbm_to_vmem [thread:$0]  %s312_s0, 256, %s17_s13, [#allocation4], %s262_s15, %s262_s15, %s263_s16  }
   0xe   :  { %s264_s19 = smov [#allocation6]  }
   0xf   :  { %s28_s20 = sshll.u32 %s264_s19, 4  ;;  %s29_s20 = int_to_ptr.vmem [resolvable:$true] %s28_s20 }
  0x10   :  { %s223_s21 = scalar_lea.vmem %s29_s20, 256  ;;  %p228_p6 = scmp.lt.s32.totalorder %s29_s20, %s29_s20 }
  0x11   :  { %p224_p5 = scmp.ne.s32.totalorder %s29_s20, %s223_s21  ;;  %p229_p7 = scmp.lt.s32.totalorder %s223_s21, %s223_s21 }
  0x13   :  { %p230_p8 = por %p229_p7, %p228_p6 }
  0x15   :  { %p231_p9 = pnand %p230_p8, %p224_p5 }
  0x17   :  { %234 = shalt.err (!%p231_p9)
}
  0x18   :  { %s265_s22 = smov 64   ;;  %s266_s23 = smov 4  }
  0x19   :  { %34 = dma.hbm_to_vmem [thread:$0]  %s313_s1, 256, %s29_s20, [#allocation7], %s265_s22, %s265_s22, %s266_s23  }
  0x1a   :  { %255 = dma.done.wait [#allocation4], 256  }
  0x1b   :  { %256 = vsyncadd [#allocation4], 4294967040 }
  0x1c   :  { %257 = dma.done.wait [#allocation7], 256  }
  0x1d   :  { %258 = vsyncadd [#allocation7], 4294967040  ;;  %vm48_vm0 = vcmask 785408   ;;  %v267_v0 = vmov 0.0   ;;  %vm268_vm1 = vmmov 0   ;;  %v193_v1 = vld [vmem:[#allocation6 + $0x8] sm:$0xff]  }
  0x1e   :  { %49 = vst.msk [vmem:[#allocation2] sm:$0xff] %vm48_vm0, %v267_v0  ;;  %50 = vst.msk [vmem:[#allocation2 + $0x8] sm:$0xff] %vm48_vm0, %v267_v0  ;;  %176 = vmatprep.subr.bf16.mxu0 %v267_v0  ;;  %180 = vmatprep.mubr.msk.bf16.mxu0 %vm268_vm1, %v267_v0  ;;  %v194_v2 = vld [vmem:[#allocation6] sm:$0xff]   ;;  %v53_v3 = vld [vmem:[#allocation3] sm:$0xff]  ;;  %vm72_vm2 = vcmask 261120   ;;  %vm144_vm3 = vcmask 781312  }
  0x1f   :  { %177 = vmatpush3.bf16.msra.mxu0 %v193_v1  ;;  %v54_v4 = vld [vmem:[#allocation3 + $0x8] sm:$0xff]  ;;  %v168_v14 = vld [vmem:[%s314_s2] ss:$0 sm:$0xff]  ;;  %s269_s26 = smov [#allocation8]  }
  0x20   :  { %178 = vmatprep.subr.bf16.mxu0 %v267_v0  ;;  %v55_v5 = vpack.c.bf16 %v54_v4, %v53_v3  ;;  %s152_s27 = sshll.u32 %s269_s26, 4  ;;  %s153_s27 = int_to_ptr.vmem [resolvable:$true] %s152_s27 }
  0x21   :  { %s235_s28 = scalar_lea.vmem %s153_s27, 128  ;;  %p240_p11 = scmp.lt.s32.totalorder %s153_s27, %s153_s27 }
  0x22   :  { %p236_p10 = scmp.ne.s32.totalorder %s153_s27, %s235_s28  ;;  %p241_p12 = scmp.lt.s32.totalorder %s235_s28, %s235_s28 }
  0x23   :  { %179 = vmatpush3.bf16.msra.mxu0 %v194_v2 }
  0x24   :  { %p242_p13 = por %p241_p12, %p240_p11 }
  0x25   :  { %v51_v6 = vld [vmem:[#allocation2] sm:$0xff]  ;;  %v52_v10 = vld [vmem:[#allocation2 + $0x8] sm:$0xff] }
  0x26   :  { %181 = vmatmul.mubr.msk.bf16.vlgmr.msra.gmra.mxu0 %vm72_vm2, %v55_v5  ;;  %p243_p0 = pnand %p242_p13, %p236_p10 }
  0xe6   :  { %v110_v7 = vpop.f32.mrf.mxu0 }
  0xe7   :  { %v117_v8 = vadd.f32 %v110_v7, %v51_v6 }
  0xe8   :  { %v182_v9 = vpop.f32.mrf.mxu0 }
  0xe9   :  { %120 = vst.msk [vmem:[#allocation2] sm:$0xff] %vm48_vm0, %v117_v8 }
  0xea   :  { %v113_v11 = vpop.f32.mrf.mxu0 }
  0xeb   :  { %v118_v12 = vadd.f32 %v113_v11, %v52_v10 }
  0xec   :  { %v183_v13 = vpop.f32.mrf.mxu0 }
  0xed   :  { %121 = vst.msk [vmem:[#allocation2 + $0x8] sm:$0xff] %vm48_vm0, %v118_v12 }
  0xf0   :  { %v125_v15 = vld [vmem:[#allocation2] sm:$0xff] }
  0xf1   :  { %v134_v16 = vadd.f32 %v168_v14, %v125_v15 }
  0xf3   :  { %v171_v17 = vpack.c.bf16 %v134_v16, %v134_v16 }
  0xf4   :  { %v126_v18 = vld [vmem:[#allocation2 + $0x8] sm:$0xff] }
  0xf5   :  { %v135_v19 = vadd.f32 %v168_v14, %v126_v18  ;;  %145 = vst.msk [vmem:[#allocation8] sm:$0xf] %vm144_vm3, %v171_v17 }
  0xf7   :  { %v172_v20 = vpack.c.bf16 %v135_v19, %v135_v19 }
  0xf9   :  { %146 = vst.msk [vmem:[#allocation8 + $0x4] sm:$0xf] %vm144_vm3, %v172_v20 }
  0xfa   :  { %246 = shalt.err (!%p243_p0)
}
  0xfb   :  { %158 = dma.vmem_to_hbm [thread:$0]  %s153_s27, 128, %s315_s3, [#allocation5], %s265_s22, %s265_s22, %s266_s23  }
  0xfc   :  { %259 = dma.done.wait [#allocation5], 128  }
  0xfd   :  { %260 = vsyncadd [#allocation5], 4294967168 }
  0xfe   :  { %162 = vsyncpa [#allocation4], 1 }
  0xff   :  { %163 = vsyncpa [#allocation7], 1 }
 0x100   :  { %164 = vsyncpa [#allocation5], 1 }

</bundles_post_ra>
